<compile_context>
chip_gen: v7x
topology: tpu7x:2x2x1
jax: 0.10.0
libtpu: 0.0.40
codegen_flags: <defaults>
</compile_context>

<pallas_src>
import functools

import jax
import jax.numpy as jnp
from jax import lax
from jax.experimental import pallas as pl
from jax.experimental.pallas import tpu as pltpu

HIDDEN = 64
LN_EPS = 1e-5
_SQRT_HALF = 0.7071067811865476


def _layernorm(x, gamma, beta):
    # PyTorch LayerNorm: biased variance, eps inside rsqrt.  Single fused pass
    # (var = E[x^2] - E[x]^2 is fine in f32 over 64 features).
    mean = jnp.mean(x, axis=-1, keepdims=True)
    msq = jnp.mean(x * x, axis=-1, keepdims=True)
    var = msq - mean * mean
    inv = lax.rsqrt(var + LN_EPS)
    return (x - mean) * inv * gamma + beta


def _gelu(x, approximate=False):
    if approximate:
        # tanh form -> EUP slot; ~1e-3 off PyTorch's default erf GELU.
        return jax.nn.gelu(x, approximate=True)
    # Exact erf form == PyTorch nn.GELU() default.
    return 0.5 * x * (1.0 + lax.erf(x * _SQRT_HALF))


# Row layout of the packed (8, HIDDEN) vector-parameter array.
_ROW_B1, _ROW_G1, _ROW_BE1, _ROW_B2, _ROW_G2, _ROW_BE2, _ROW_W3, _ROW_B3 = range(8)


def critic_kernel(obs_ref, w1_ref, w2_ref, vec_ref, out_ref, *,
                  approximate_gelu=False):
    b1 = vec_ref[_ROW_B1:_ROW_B1 + 1, :]
    g1 = vec_ref[_ROW_G1:_ROW_G1 + 1, :]
    be1 = vec_ref[_ROW_BE1:_ROW_BE1 + 1, :]
    b2 = vec_ref[_ROW_B2:_ROW_B2 + 1, :]
    g2 = vec_ref[_ROW_G2:_ROW_G2 + 1, :]
    be2 = vec_ref[_ROW_BE2:_ROW_BE2 + 1, :]
    w3_row = vec_ref[_ROW_W3:_ROW_W3 + 1, :]        # (1, HIDDEN)
    b3 = vec_ref[_ROW_B3:_ROW_B3 + 1, 0:1]          # (1, 1)

    # Linear 1 (MXU; obs/w1 may be bf16, accumulation in f32) + LN + GELU.
    h = jnp.dot(obs_ref[...], w1_ref[...],
                preferred_element_type=jnp.float32) + b1
    h = _gelu(_layernorm(h, g1, be1), approximate_gelu)

    # Linear 2 (f32 64x64 MXU) + LN + GELU.
    h = jnp.dot(h, w2_ref[...], preferred_element_type=jnp.float32) + b2
    h = _gelu(_layernorm(h, g2, be2), approximate_gelu)

    # Final Linear(64 -> 1): VPU multiply + XLU transpose + sublane reduce,
    # producing a lane-dense (1, batch_tile) row (no N=1 MXU pass, no masked
    # column stores).
    hw_t = (h * w3_row).T                           # (HIDDEN, batch_tile)
    v = jnp.sum(hw_t, axis=0, keepdims=True) + b3   # (1, batch_tile)
    out_ref[...] = v.astype(out_ref.dtype)


def _pick_batch_tile(batch, requested):
    if requested is not None:
        return requested
    # Lane-aligned tile so the (1, batch_tile) output block is unmasked and
    # the grid has multiple parallel steps (pipelining; both TCs on v7x).
    for t in (2048, 1024, 512, 256, 128):
        if batch % t == 0:
            return t
    return batch


def critic_forward(obs, packed_params, *, batch_tile=None,
                   approximate_gelu=False, vmem_limit_bytes=None):
    """obs: (B, D).  packed_params: (w1 (D,64), w2 (64,64), vecs (8,64))."""
    w1, w2, vecs = packed_params
    B, D = obs.shape
    bt = _pick_batch_tile(B, batch_tile)
    assert B % bt == 0, "batch must be divisible by batch_tile"
    assert bt == B or bt % 128 == 0, (
        "tiled batch requires a lane-aligned (multiple of 128) batch_tile")
    num_tiles = B // bt

    kernel = functools.partial(critic_kernel, approximate_gelu=approximate_gelu)

    # Advisory cost so XLA can overlap this small call with neighbouring ops.
    flops = 2 * B * (D * HIDDEN + HIDDEN * HIDDEN + HIDDEN)
    bytes_accessed = (obs.size * obs.dtype.itemsize
                      + w1.size * w1.dtype.itemsize
                      + w2.size * w2.dtype.itemsize
                      + vecs.size * vecs.dtype.itemsize
                      + B * 4)
    cost = pl.CostEstimate(flops=flops, transcendentals=2 * B * HIDDEN,
                           bytes_accessed=bytes_accessed)

    out_row = pl.pallas_call(
        kernel,
        out_shape=jax.ShapeDtypeStruct((1, B), jnp.float32),
        grid_spec=pltpu.PrefetchScalarGridSpec(
            num_scalar_prefetch=0,
            grid=(num_tiles,),
            in_specs=[
                pl.BlockSpec((bt, D), lambda i: (i, 0)),        # obs tile
                pl.BlockSpec(w1.shape, lambda i: (0, 0)),       # w1 (resident)
                pl.BlockSpec(w2.shape, lambda i: (0, 0)),       # w2 (resident)
                pl.BlockSpec(vecs.shape, lambda i: (0, 0)),     # packed vectors
            ],
            out_specs=pl.BlockSpec((1, bt), lambda i: (0, i)),  # lane-dense row
        ),
        compiler_params=pltpu.CompilerParams(
            dimension_semantics=("parallel",),
            # batch_tile <= 2048 keeps 2x(obs tile + intermediates) far under
            # the default scoped VMEM on v5e/v6e/v7x; raise only if tiles are
            # grown further.
            vmem_limit_bytes=vmem_limit_bytes),
        cost_estimate=cost,
    )(obs, w1, w2, vecs)

    # (1, B) -> (B, 1): identical row-major layout, free reshape.
    return out_row.reshape(B, 1)


def init_params(key, obs_space_size):
    """PyTorch-style nn.Linear init; LayerNorm weight=1, bias=0."""
    ks = jax.random.split(key, 3)

    def lin_init(k, fan_in, fan_out):
        bound = 1.0 / (fan_in ** 0.5)
        kw, kb = jax.random.split(k)
        w = jax.random.uniform(kw, (fan_in, fan_out), jnp.float32, -bound, bound)
        b = jax.random.uniform(kb, (1, fan_out), jnp.float32, -bound, bound)
        return w, b

    w1, b1 = lin_init(ks[0], obs_space_size, HIDDEN)
    w2, b2 = lin_init(ks[1], HIDDEN, HIDDEN)
    w3, b3 = lin_init(ks[2], HIDDEN, 1)
    g1 = jnp.ones((1, HIDDEN), jnp.float32)
    be1 = jnp.zeros((1, HIDDEN), jnp.float32)
    g2 = jnp.ones((1, HIDDEN), jnp.float32)
    be2 = jnp.zeros((1, HIDDEN), jnp.float32)
    return (w1, b1, g1, be1, w2, b2, g2, be2, w3, b3)


def pack_params(params, *, w1_dtype=jnp.float32, w2_dtype=jnp.float32):
    """Pack the eight (1,64) vector params into one (8,64) array."""
    (w1, b1, g1, be1, w2, b2, g2, be2, w3, b3) = params
    vecs = jnp.concatenate([
        b1, g1, be1, b2, g2, be2,
        w3.reshape(1, HIDDEN),                              # final weights as a row
        jnp.broadcast_to(b3.reshape(1, 1), (1, HIDDEN)),    # final bias (broadcast)
    ], axis=0).astype(jnp.float32)
    return w1.astype(w1_dtype), w2.astype(w2_dtype), vecs


def critic_forward_ref(obs, packed_params, *, approximate_gelu=False):
    """Pure-JAX reference (same packed params / same formulas)."""
    w1, w2, vecs = packed_params
    b1, g1, be1 = vecs[0:1], vecs[1:2], vecs[2:3]
    b2, g2, be2 = vecs[3:4], vecs[4:5], vecs[5:6]
    w3_row, b3 = vecs[6:7], vecs[7:8, 0:1]
    h = obs.astype(jnp.float32) @ w1.astype(jnp.float32) + b1
    h = _gelu(_layernorm(h, g1, be1), approximate_gelu)
    h = h @ w2.astype(jnp.float32) + b2
    h = _gelu(_layernorm(h, g2, be2), approximate_gelu)
    return jnp.sum(h * w3_row, axis=-1, keepdims=True) + b3


if __name__ == "__main__":
    key = jax.random.PRNGKey(0)
    k_obs, k_obs2, k_params = jax.random.split(key, 3)

    batch = 8
    obs_space_size = 32
    obs = jax.random.normal(k_obs, (batch, obs_space_size), jnp.float32)
    params = init_params(k_params, obs_space_size)

    # bf16 obs / w1 halve the dominant HBM read and feed the MXU natively;
    # LN / GELU stay in f32 inside the kernel.  The reference sees the same
    # bf16-rounded inputs so the comparison isolates kernel correctness.
    obs_bf16 = obs.astype(jnp.bfloat16)
    packed = pack_params(params, w1_dtype=jnp.bfloat16)

    out = critic_forward(obs_bf16, packed)
    out = jax.block_until_ready(out)
    ref = critic_forward_ref(obs_bf16, packed)
    assert out.shape == (batch, 1)
    assert jnp.allclose(out, ref, atol=1e-4, rtol=1e-4), (out, ref)

    # Also exercise the multi-tile (pipelined, lane-aligned) grid path.
    batch2 = 384  # -> batch_tile = 128, grid = (3,)
    obs2 = jax.random.normal(k_obs2, (batch2, obs_space_size),
                             jnp.float32).astype(jnp.bfloat16)
    out2 = jax.block_until_ready(critic_forward(obs2, packed))
    ref2 = critic_forward_ref(obs2, packed)
    assert out2.shape == (batch2, 1)
    assert jnp.allclose(out2, ref2, atol=1e-4, rtol=1e-4)

    print("KERNEL_OK")
</pallas_src>

<mosaic_0001>
module attributes {stable_mosaic.version = 11 : i64} {
  func.func @critic_kernel(%arg0: i32, %arg1: memref<8x32xbf16, #tpu.memory_space<vmem>>, %arg2: memref<32x64xbf16, #tpu.memory_space<vmem>>, %arg3: memref<64x64xf32, #tpu.memory_space<vmem>>, %arg4: memref<8x64xf32, #tpu.memory_space<vmem>>, %arg5: memref<1x8xf32, #tpu.memory_space<vmem>>) attributes {dimension_semantics = [#tpu.dimension_semantics<parallel>], iteration_bounds = array<i64: 1>, scalar_prefetch = 0 : i64, scratch_operands = 0 : i64, tpu.core_type = #tpu.core_type<tc>, window_params = [{transform_indices = @transform_0, window_bounds = array<i64: 8, 32>}, {pipeline_mode = #tpu.pipeline_mode<synchronous>, transform_indices = @transform_1, window_bounds = array<i64: 32, 64>}, {pipeline_mode = #tpu.pipeline_mode<synchronous>, transform_indices = @transform_2, window_bounds = array<i64: 64, 64>}, {pipeline_mode = #tpu.pipeline_mode<synchronous>, transform_indices = @transform_3, window_bounds = array<i64: 8, 64>}, {transform_indices = @transform_4, window_bounds = array<i64: 1, 8>}]} {
    %c0 = arith.constant 0 : index
    %c0_0 = arith.constant 0 : index
    %0 = vector.load %arg4[%c0, %c0_0] : memref<8x64xf32, #tpu.memory_space<vmem>>, vector<1x64xf32>
    %c1 = arith.constant 1 : index
    %c0_1 = arith.constant 0 : index
    %1 = vector.load %arg4[%c1, %c0_1] : memref<8x64xf32, #tpu.memory_space<vmem>>, vector<1x64xf32>
    %c2 = arith.constant 2 : index
    %c0_2 = arith.constant 0 : index
    %2 = vector.load %arg4[%c2, %c0_2] : memref<8x64xf32, #tpu.memory_space<vmem>>, vector<1x64xf32>
    %c3 = arith.constant 3 : index
    %c0_3 = arith.constant 0 : index
    %3 = vector.load %arg4[%c3, %c0_3] : memref<8x64xf32, #tpu.memory_space<vmem>>, vector<1x64xf32>
    %c4 = arith.constant 4 : index
    %c0_4 = arith.constant 0 : index
    %4 = vector.load %arg4[%c4, %c0_4] : memref<8x64xf32, #tpu.memory_space<vmem>>, vector<1x64xf32>
    %c5 = arith.constant 5 : index
    %c0_5 = arith.constant 0 : index
    %5 = vector.load %arg4[%c5, %c0_5] : memref<8x64xf32, #tpu.memory_space<vmem>>, vector<1x64xf32>
    %c6 = arith.constant 6 : index
    %c0_6 = arith.constant 0 : index
    %6 = vector.load %arg4[%c6, %c0_6] : memref<8x64xf32, #tpu.memory_space<vmem>>, vector<1x64xf32>
    %c7 = arith.constant 7 : index
    %c0_7 = arith.constant 0 : index
    %7 = vector.load %arg4[%c7, %c0_7] : memref<8x64xf32, #tpu.memory_space<vmem>>, vector<1x1xf32>
    %c0_8 = arith.constant 0 : index
    %c0_9 = arith.constant 0 : index
    %8 = vector.load %arg1[%c0_8, %c0_9] : memref<8x32xbf16, #tpu.memory_space<vmem>>, vector<8x32xbf16>
    %c0_10 = arith.constant 0 : index
    %c0_11 = arith.constant 0 : index
    %9 = vector.load %arg2[%c0_10, %c0_11] : memref<32x64xbf16, #tpu.memory_space<vmem>>, vector<32x64xbf16>
    %cst = arith.constant dense<0.000000e+00> : vector<8x64xf32>
    %10 = tpu.matmul %8, %9, %cst {dimension_numbers = #tpu.dot_dimension_numbers<[1], [0], [0], [1], [0, 0, 1, 1], [], []>} : vector<8x32xbf16>, vector<32x64xbf16>, vector<8x64xf32> -> vector<8x64xf32>
    %11 = vector.broadcast %0 : vector<1x64xf32> to vector<8x64xf32>
    %12 = arith.addf %10, %11 : vector<8x64xf32>
    %cst_12 = arith.constant dense<0.000000e+00> : vector<8xf32>
    %13 = vector.multi_reduction <add>, %12, %cst_12 [1] : vector<8x64xf32> to vector<8xf32>
    %14 = vector.shape_cast %13 : vector<8xf32> to vector<8x1xf32>
    %cst_13 = arith.constant 6.400000e+01 : f32
    %15 = vector.broadcast %cst_13 : f32 to vector<8x1xf32>
    %16 = arith.divf %14, %15 : vector<8x1xf32>
    %17 = arith.mulf %12, %12 : vector<8x64xf32>
    %cst_14 = arith.constant dense<0.000000e+00> : vector<8xf32>
    %18 = vector.multi_reduction <add>, %17, %cst_14 [1] : vector<8x64xf32> to vector<8xf32>
    %19 = vector.shape_cast %18 : vector<8xf32> to vector<8x1xf32>
    %cst_15 = arith.constant 6.400000e+01 : f32
    %20 = vector.broadcast %cst_15 : f32 to vector<8x1xf32>
    %21 = arith.divf %19, %20 : vector<8x1xf32>
    %22 = arith.mulf %16, %16 : vector<8x1xf32>
    %23 = arith.subf %21, %22 : vector<8x1xf32>
    %cst_16 = arith.constant 9.99999974E-6 : f32
    %24 = vector.broadcast %cst_16 : f32 to vector<8x1xf32>
    %25 = arith.addf %23, %24 : vector<8x1xf32>
    %26 = math.rsqrt %25 : vector<8x1xf32>
    %27 = vector.broadcast %16 : vector<8x1xf32> to vector<8x64xf32>
    %28 = arith.subf %12, %27 : vector<8x64xf32>
    %29 = vector.broadcast %26 : vector<8x1xf32> to vector<8x64xf32>
    %30 = arith.mulf %28, %29 : vector<8x64xf32>
    %31 = vector.broadcast %1 : vector<1x64xf32> to vector<8x64xf32>
    %32 = arith.mulf %30, %31 : vector<8x64xf32>
    %33 = vector.broadcast %2 : vector<1x64xf32> to vector<8x64xf32>
    %34 = arith.addf %32, %33 : vector<8x64xf32>
    %cst_17 = arith.constant 5.000000e-01 : f32
    %35 = vector.broadcast %cst_17 : f32 to vector<8x64xf32>
    %36 = arith.mulf %35, %34 : vector<8x64xf32>
    %cst_18 = arith.constant 0.707106769 : f32
    %37 = vector.broadcast %cst_18 : f32 to vector<8x64xf32>
    %38 = arith.mulf %34, %37 : vector<8x64xf32>
    %39 = math.erf %38 : vector<8x64xf32>
    %cst_19 = arith.constant 1.000000e+00 : f32
    %40 = vector.broadcast %cst_19 : f32 to vector<8x64xf32>
    %41 = arith.addf %40, %39 : vector<8x64xf32>
    %42 = arith.mulf %36, %41 : vector<8x64xf32>
    %c0_20 = arith.constant 0 : index
    %c0_21 = arith.constant 0 : index
    %43 = vector.load %arg3[%c0_20, %c0_21] : memref<64x64xf32, #tpu.memory_space<vmem>>, vector<64x64xf32>
    %cst_22 = arith.constant dense<0.000000e+00> : vector<8x64xf32>
    %44 = tpu.matmul %42, %43, %cst_22 {dimension_numbers = #tpu.dot_dimension_numbers<[1], [0], [0], [1], [0, 0, 1, 1], [], []>} : vector<8x64xf32>, vector<64x64xf32>, vector<8x64xf32> -> vector<8x64xf32>
    %45 = vector.broadcast %3 : vector<1x64xf32> to vector<8x64xf32>
    %46 = arith.addf %44, %45 : vector<8x64xf32>
    %cst_23 = arith.constant dense<0.000000e+00> : vector<8xf32>
    %47 = vector.multi_reduction <add>, %46, %cst_23 [1] : vector<8x64xf32> to vector<8xf32>
    %48 = vector.shape_cast %47 : vector<8xf32> to vector<8x1xf32>
    %cst_24 = arith.constant 6.400000e+01 : f32
    %49 = vector.broadcast %cst_24 : f32 to vector<8x1xf32>
    %50 = arith.divf %48, %49 : vector<8x1xf32>
    %51 = arith.mulf %46, %46 : vector<8x64xf32>
    %cst_25 = arith.constant dense<0.000000e+00> : vector<8xf32>
    %52 = vector.multi_reduction <add>, %51, %cst_25 [1] : vector<8x64xf32> to vector<8xf32>
    %53 = vector.shape_cast %52 : vector<8xf32> to vector<8x1xf32>
    %cst_26 = arith.constant 6.400000e+01 : f32
    %54 = vector.broadcast %cst_26 : f32 to vector<8x1xf32>
    %55 = arith.divf %53, %54 : vector<8x1xf32>
    %56 = arith.mulf %50, %50 : vector<8x1xf32>
    %57 = arith.subf %55, %56 : vector<8x1xf32>
    %cst_27 = arith.constant 9.99999974E-6 : f32
    %58 = vector.broadcast %cst_27 : f32 to vector<8x1xf32>
    %59 = arith.addf %57, %58 : vector<8x1xf32>
    %60 = math.rsqrt %59 : vector<8x1xf32>
    %61 = vector.broadcast %50 : vector<8x1xf32> to vector<8x64xf32>
    %62 = arith.subf %46, %61 : vector<8x64xf32>
    %63 = vector.broadcast %60 : vector<8x1xf32> to vector<8x64xf32>
    %64 = arith.mulf %62, %63 : vector<8x64xf32>
    %65 = vector.broadcast %4 : vector<1x64xf32> to vector<8x64xf32>
    %66 = arith.mulf %64, %65 : vector<8x64xf32>
    %67 = vector.broadcast %5 : vector<1x64xf32> to vector<8x64xf32>
    %68 = arith.addf %66, %67 : vector<8x64xf32>
    %cst_28 = arith.constant 5.000000e-01 : f32
    %69 = vector.broadcast %cst_28 : f32 to vector<8x64xf32>
    %70 = arith.mulf %69, %68 : vector<8x64xf32>
    %cst_29 = arith.constant 0.707106769 : f32
    %71 = vector.broadcast %cst_29 : f32 to vector<8x64xf32>
    %72 = arith.mulf %68, %71 : vector<8x64xf32>
    %73 = math.erf %72 : vector<8x64xf32>
    %cst_30 = arith.constant 1.000000e+00 : f32
    %74 = vector.broadcast %cst_30 : f32 to vector<8x64xf32>
    %75 = arith.addf %74, %73 : vector<8x64xf32>
    %76 = arith.mulf %70, %75 : vector<8x64xf32>
    %77 = vector.broadcast %6 : vector<1x64xf32> to vector<8x64xf32>
    %78 = arith.mulf %76, %77 : vector<8x64xf32>
    %79 = tpu.transpose %78, [1, 0] : vector<8x64xf32> -> vector<64x8xf32>
    %cst_31 = arith.constant dense<0.000000e+00> : vector<8xf32>
    %80 = vector.multi_reduction <add>, %79, %cst_31 [0] : vector<64x8xf32> to vector<8xf32>
    %81 = vector.shape_cast %80 : vector<8xf32> to vector<1x8xf32>
    %82 = vector.broadcast %7 : vector<1x1xf32> to vector<1x8xf32>
    %83 = arith.addf %81, %82 : vector<1x8xf32>
    %c0_32 = arith.constant 0 : index
    %c0_33 = arith.constant 0 : index
    %84 = vector.load %arg5[%c0_32, %c0_33] : memref<1x8xf32, #tpu.memory_space<vmem>>, vector<1x8xf32>
    tpu.vector_store %arg5[%c0_32, %c0_33], %83 {strides = array<i32>} : memref<1x8xf32, #tpu.memory_space<vmem>>, vector<1x8xf32>,
    return
  }
  func.func @transform_0(%arg0: i32) -> (i32, i32) {
    %c0_i32 = arith.constant 0 : i32
    %c0_i32_0 = arith.constant 0 : i32
    return %arg0, %c0_i32 : i32, i32
  }
  func.func @transform_1(%arg0: i32) -> (i32, i32) {
    %c0_i32 = arith.constant 0 : i32
    %c0_i32_0 = arith.constant 0 : i32
    %c0_i32_1 = arith.constant 0 : i32
    return %c0_i32, %c0_i32_0 : i32, i32
  }
  func.func @transform_2(%arg0: i32) -> (i32, i32) {
    %c0_i32 = arith.constant 0 : i32
    %c0_i32_0 = arith.constant 0 : i32
    %c0_i32_1 = arith.constant 0 : i32
    return %c0_i32, %c0_i32_0 : i32, i32
  }
  func.func @transform_3(%arg0: i32) -> (i32, i32) {
    %c0_i32 = arith.constant 0 : i32
    %c0_i32_0 = arith.constant 0 : i32
    %c0_i32_1 = arith.constant 0 : i32
    return %c0_i32, %c0_i32_0 : i32, i32
  }
  func.func @transform_4(%arg0: i32) -> (i32, i32) {
    %c0_i32 = arith.constant 0 : i32
    %c0_i32_0 = arith.constant 0 : i32
    return %c0_i32, %arg0 : i32, i32
  }
}

</mosaic_0001>

<bundles_post_ra>
// kernel: tpu_custom_call.1
= control target key start
LH: loop header
LB: loop body
LE: loop exit
PB: predicated region body
PF: predicated region fallthrough
CT: control target
= control target key end

     0   :  { %9 = vsyncpa [#allocation3], 0  ;;  %s662_s0 = inlined_call_operand.hbm [shape: bf16[8,32], index: 0, kind: input, shape index: {}]   ;;  %s663_s1 = inlined_call_operand.hbm [shape: bf16[32,64], index: 1, kind: input, shape index: {}]   ;;  %s664_s2 = inlined_call_operand.hbm [shape: f32[64,64], index: 2, kind: input, shape index: {}]   ;;  %s665_s3 = inlined_call_operand.vmem [shape: f32[8,64], index: 3, kind: input, shape index: {}]   ;;  %s666_s4 = inlined_call_operand.hbm [shape: f32[1,8], index: 4, kind: output, shape index: {}]  }
   0x1   :  { %10 = vsyncpa [#allocation6], 0 }
   0x2   :  { %11 = vsyncpa [#allocation4], 0  ;;  %s540_s15 = smov [#allocation5]   ;;  %s446_s19 = scalar_lea.hbm %s663_s1, 256 }
   0x3   :  { %s27_s16 = sshll.u32 %s540_s15, 4  ;;  %p447_p0 = scmp.ne.s32.totalorder %s663_s1, %s446_s19  ;;  %s28_s16 = int_to_ptr.vmem [resolvable:$true] %s27_s16 }
   0x4   :  { %p450_p1 = scmp.lt.u32.totalorder %s446_s19, %s663_s1 }
   0x6   :  { %p452_p2 = pnand %p450_p1, %p447_p0 }
   0x8   :  { %455 = shalt.err (!%p452_p2)
}
   0x9   :  { %s456_s24 = scalar_lea.vmem %s28_s16, 256  ;;  %p461_p4 = scmp.lt.s32.totalorder %s28_s16, %s28_s16 }
   0xa   :  { %p457_p3 = scmp.ne.s32.totalorder %s28_s16, %s456_s24  ;;  %p462_p5 = scmp.lt.s32.totalorder %s456_s24, %s456_s24 }
   0xc   :  { %p463_p6 = por %p462_p5, %p461_p4 }
   0xe   :  { %p464_p7 = pnand %p463_p6, %p457_p3 }
  0x10   :  { %467 = shalt.err (!%p464_p7)
}
  0x11   :  { %s541_s25 = smov 64   ;;  %s542_s26 = smov 4  }
  0x12   :  { %33 = dma.hbm_to_vmem [thread:$0]  %s663_s1, 256, %s28_s16, [#allocation6], %s541_s25, %s541_s25, %s542_s26  }
  0x13   :  { %s543_s29 = smov [#allocation2]   ;;  %s544_s5 = smov [#allocation7]  }
  0x14   :  { %s18_s30 = sshll.u32 %s543_s29, 4  ;;  %s39_s6 = sshll.u32 %s544_s5, 4  ;;  %s19_s30 = int_to_ptr.vmem [resolvable:$true] %s18_s30  ;;  %s40_s6 = int_to_ptr.vmem [resolvable:$true] %s39_s6 }
  0x15   :  { %s468_s9 = scalar_lea.hbm %s662_s0, 64 }
  0x16   :  { %p469_p8 = scmp.ne.s32.totalorder %s662_s0, %s468_s9  ;;  %p472_p9 = scmp.lt.u32.totalorder %s468_s9, %s662_s0 }
  0x18   :  { %p474_p10 = pnand %p472_p9, %p469_p8 }
  0x1a   :  { %477 = shalt.err (!%p474_p10)
}
  0x1b   :  { %s478_s1 = scalar_lea.vmem %s19_s30, 64  ;;  %p483_p12 = scmp.lt.s32.totalorder %s19_s30, %s19_s30 }
  0x1c   :  { %p479_p11 = scmp.ne.s32.totalorder %s19_s30, %s478_s1  ;;  %p484_p13 = scmp.lt.s32.totalorder %s478_s1, %s478_s1 }
  0x1e   :  { %p485_p0 = por %p484_p13, %p483_p12 }
  0x20   :  { %p486_p1 = pnand %p485_p0, %p479_p11 }
  0x22   :  { %489 = shalt.err (!%p486_p1)
}
  0x23   :  { %21 = dma.hbm_to_vmem [thread:$0]  %s662_s0, 64, %s19_s30, [#allocation3]  }
  0x24   :  { %s490_s18 = scalar_lea.hbm %s664_s2, 1024 }
  0x25   :  { %p491_p2 = scmp.ne.s32.totalorder %s664_s2, %s490_s18  ;;  %p494_p3 = scmp.lt.u32.totalorder %s490_s18, %s664_s2 }
  0x27   :  { %p496_p4 = pnand %p494_p3, %p491_p2 }
  0x29   :  { %499 = shalt.err (!%p496_p4)
}
  0x2a   :  { %s500_s23 = scalar_lea.vmem %s40_s6, 1024  ;;  %p505_p6 = scmp.lt.s32.totalorder %s40_s6, %s40_s6 }
  0x2b   :  { %p501_p5 = scmp.ne.s32.totalorder %s40_s6, %s500_s23  ;;  %p506_p7 = scmp.lt.s32.totalorder %s500_s23, %s500_s23 }
  0x2d   :  { %p507_p8 = por %p506_p7, %p505_p6 }
  0x2f   :  { %p508_p9 = pnand %p507_p8, %p501_p5 }
  0x31   :  { %511 = shalt.err (!%p508_p9)
}
  0x32   :  { %s545_s0 = smov 128   ;;  %s546_s24 = smov 8  }
  0x33   :  { %45 = dma.hbm_to_vmem [thread:$0]  %s664_s2, 1024, %s40_s6, [#allocation6], %s545_s0, %s545_s0, %s546_s24  }
  0x34   :  { %534 = dma.done.wait [#allocation3], 64  }
  0x35   :  { %535 = vsyncadd [#allocation3], 4294967232 }
  0x36   :  { %536 = dma.done.wait [#allocation6], 1280  }
  0x37   :  { %537 = vsyncadd [#allocation6], 4294966016  ;;  %v547_v0 = vmov 0.0   ;;  %vm548_vm0 = vmmov 0   ;;  %v436_v1 = vld [vmem:[#allocation5] sm:$0xff]   ;;  %v437_v2 = vld [vmem:[#allocation5 + $0x8] sm:$0xff]  }
  0x38   :  { %384 = vmatprep.subr.bf16.mxu0 %v547_v0  ;;  %388 = vmatprep.mubr.msk.bf16.mxu0 %vm548_vm0, %v547_v0  ;;  %v66_v3 = vld [vmem:[#allocation2] sm:$0xf]  ;;  %vm87_vm1 = vcmask 261120   ;;  %v361_v4 = vld [vmem:[%s665_s3] ss:$0 sm:$0xff]  ;;  %vm131_vm2 = vcmask 523264  }
  0x39   :  { %408 = vmatprep.mubr.msk.f32.mxu1 %vm548_vm0, %v547_v0  ;;  %385 = vmatpush3.bf16.msra.mxu0 %v436_v1  ;;  %v163_v13 = vld [vmem:[#allocation7] sm:$0xff]  ;;  %v164_v14 = vld [vmem:[#allocation7 + $0x8] sm:$0xff]  ;;  %v165_v15 = vld [vmem:[#allocation7 + $0x10] sm:$0xff]  ;;  %v549_v16 = vmov 0.0|0.0   ;;  %v550_v53 = vmov 0   ;;  %vm315_vm3 = vcmask 64512  }
  0x3a   :  { %386 = vmatprep.subr.bf16.mxu0 %v547_v0  ;;  %411 = vmatprep.subr.bf16.mxu1 %v549_v16  ;;  %v412_v17 = vpack.c.bf16 %v164_v14, %v163_v13  ;;  %v166_v18 = vld [vmem:[#allocation7 + $0x18] sm:$0xff]  ;;  %v167_v20 = vld [vmem:[#allocation7 + $0x20] sm:$0xff]  ;;  %v168_v21 = vld [vmem:[#allocation7 + $0x28] sm:$0xff]  ;;  %vm343_vm4 = vcmask 57344  }
  0x3b   :  { %v415_v19 = vpack.c.bf16 %v166_v18, %v165_v15  ;;  %v418_v22 = vpack.c.bf16 %v168_v21, %v167_v20  ;;  %v169_v23 = vld [vmem:[#allocation7 + $0x30] sm:$0xff]  ;;  %v170_v24 = vld [vmem:[#allocation7 + $0x38] sm:$0xff]  ;;  %v365_v35 = vld [vmem:[%s665_s3 + $0x1] ss:$0 sm:$0xff]  ;;  %435 = vset.pattern.permute.xlu0 %v550_v53 }
  0x3c   :  { %413 = vmatpush3.bf16.msra.mxu1 %v412_v17  ;;  %v421_v25 = vpack.c.bf16 %v170_v24, %v169_v23  ;;  %v366_v37 = vld [vmem:[%s665_s3 + $0x2] ss:$0 sm:$0xff]  ;;  %v367_v45 = vld [vmem:[%s665_s3 + $0x3] ss:$0 sm:$0xff]  ;;  %v65_v52 = vld [vmem:[%s665_s3 + $0x7] sm:$0x1] }
  0x3d   :  { %387 = vmatpush3.bf16.msra.mxu0 %v437_v2  ;;  %414 = vmatprep.subr.bf16.mxu1 %v549_v16  ;;  %v369_v63 = vld [vmem:[%s665_s3 + $0x4] ss:$0 sm:$0xff]  ;;  %v370_v1 = vld [vmem:[%s665_s3 + $0x5] ss:$0 sm:$0xff] }
  0x40   :  { %389 = vmatmul.mubr.msk.bf16.vlgmr.msra.gmra.mrb[0].mxu0 %vm87_vm1, %v66_v3  ;;  %416 = vmatpush3.bf16.msra.mxu1 %v415_v19 }
  0x41   :  { %417 = vmatprep.subr.bf16.mxu1 %v549_v16 }
  0x44   :  { %419 = vmatpush3.bf16.msra.mxu1 %v418_v22 }
  0x45   :  { %420 = vmatprep.subr.bf16.mxu1 %v549_v16 }
  0x48   :  { %422 = vmatpush3.bf16.msra.mxu1 %v421_v25 }
 0x113   :  { %v125_v5 = vpop.f32.mrb[0].mxu0 }
 0x114   :  { %v126_v6 = vadd.f32 %v361_v4, %v125_v5  ;;  %v390_v7 = vpop.f32.mrb[1].mxu0 }
 0x115   :  { %v128_v8 = vpop.f32.mrb[2].mxu0 }
 0x116   :  { %v391_v9 = vpop.f32.mrb[3].mxu0  ;;  %v132_v10 = vsel %vm131_vm2, %v126_v6, 0.0  ;;  %v137_v11 = vmul.f32 %v126_v6, %v126_v6  ;;  %v371_v8 = vld [vmem:[%s665_s3 + $0x6] ss:$0 sm:$0xff]  ;;  %s551_s3 = smov [#allocation8]  }
 0x117   :  { %133 = vadd.xlane.f32.xlu0 %v132_v10  ;;  %s351_s15 = sshll.u32 %s551_s3, 4  ;;  %s352_s15 = int_to_ptr.vmem [resolvable:$true] %s351_s15 }
 0x118   :  { %v138_v12 = vsel %vm131_vm2, %v137_v11, 0.0  ;;  %s512_s16 = scalar_lea.vmem %s352_s15, 16  ;;  %s516_s17 = scalar_lea.vmem %s352_s15, 32 }
 0x119   :  { %p513_p10 = scmp.ne.s32.totalorder %s352_s15, %s512_s16  ;;  %p517_p11 = scmp.lt.s32.totalorder %s352_s15, %s352_s15 }
 0x11a   :  { %p518_p12 = scmp.lt.s32.totalorder %s516_s17, %s512_s16 }
 0x11b   :  { %139 = vadd.xlane.f32.xlu0 %v138_v12 }
 0x11c   :  { %p519_p13 = por %p518_p12, %p517_p11 }
 0x11e   :  { %p520_p0 = pnand %p519_p13, %p513_p10 }
 0x131   :  { %339 = vperm.xlu0 %435, %v65_v52  }
 0x1a4   :  { %v134_v26 = vpop.xlane.xlu0 %133 }
 0x1a5   :  { %v136_v27 = vmul.f32 0.015625, %v134_v26 }
 0x1a7   :  { %v142_v29 = vmul.f32 %v136_v27, %v136_v27  ;;  %v146_v33 = vsub.f32 %v126_v6, %v136_v27 }
 0x1a8   :  { %v140_v28 = vpop.xlane.xlu0 %139 }
 0x1a9   :  { %v141_v30 = vmul.f32 0.015625, %v140_v28 }
 0x1ab   :  { %v143_v31 = vsub.f32 %v141_v30, %v142_v29 }
 0x1ad   :  { %v144_v32 = vadd.f32 1e-05, %v143_v31 }
 0x1af   :  { %438 = vrsqrt.f32 %v144_v32 }
 0x1b9   :  { %v439_v34 = vpop.eup %438 }
 0x1ba   :  { %v147_v36 = vmul.f32 %v439_v34, %v146_v33 }
 0x1bc   :  { %v152_v38 = vmul.f32 %v365_v35, %v147_v36 }
 0x1be   :  { %v157_v39 = vadd.f32 %v366_v37, %v152_v38 }
 0x1c0   :  { %v159_v40 = vmul.f32 0.70710677, %v157_v39  ;;  %v158_v42 = vmul.f32 0.5, %v157_v39  ;;  %v340_v39 = vpop.permute.xlu0 %339 }
 0x1c2   :  { %440 = verf.f32 %v159_v40 }
 0x1cc   :  { %v441_v41 = vpop.eup %440 }
 0x1cd   :  { %v161_v43 = vadd.f32 1.0, %v441_v41 }
 0x1cf   :  { %v162_v44 = vmul.f32 %v161_v43, %v158_v42 }
 0x1d1   :  { %409 = vmatmul.mubr.msk.f32.vlgmr.msra.gmra.mrb[0].mxu1 %vm131_vm2, %v162_v44 }
 0x2a4   :  { %v244_v46 = vpop.f32.mrb[0].mxu1 }
 0x2a5   :  { %v245_v47 = vadd.f32 %v367_v45, %v244_v46  ;;  %v410_v48 = vpop.f32.mrb[1].mxu1 }
 0x2a7   :  { %v248_v49 = vsel %vm131_vm2, %v245_v47, 0.0  ;;  %v252_v50 = vmul.f32 %v245_v47, %v245_v47 }
 0x2a8   :  { %249 = vadd.xlane.f32.xlu1 %v248_v49 }
 0x2a9   :  { %v253_v51 = vsel %vm131_vm2, %v252_v50, 0.0 }
 0x2ac   :  { %254 = vadd.xlane.f32.xlu1 %v253_v51 }
 0x335   :  { %v250_v54 = vpop.xlane.xlu1 %249 }
 0x336   :  { %v251_v55 = vmul.f32 0.015625, %v250_v54 }
 0x338   :  { %v257_v57 = vmul.f32 %v251_v55, %v251_v55  ;;  %v261_v61 = vsub.f32 %v245_v47, %v251_v55 }
 0x339   :  { %v255_v56 = vpop.xlane.xlu1 %254 }
 0x33a   :  { %v256_v58 = vmul.f32 0.015625, %v255_v56 }
 0x33c   :  { %v258_v59 = vsub.f32 %v256_v58, %v257_v57 }
 0x33e   :  { %v259_v60 = vadd.f32 1e-05, %v258_v59 }
 0x340   :  { %442 = vrsqrt.f32 %v259_v60 }
 0x34a   :  { %v443_v62 = vpop.eup %442 }
 0x34b   :  { %v262_v0 = vmul.f32 %v443_v62, %v261_v61 }
 0x34d   :  { %v267_v2 = vmul.f32 %v369_v63, %v262_v0 }
 0x34f   :  { %v272_v3 = vadd.f32 %v370_v1, %v267_v2 }
 0x351   :  { %v274_v4 = vmul.f32 0.70710677, %v272_v3  ;;  %v273_v6 = vmul.f32 0.5, %v272_v3 }
 0x353   :  { %444 = verf.f32 %v274_v4 }
 0x35d   :  { %v445_v5 = vpop.eup %444 }
 0x35e   :  { %v276_v7 = vadd.f32 1.0, %v445_v5 }
 0x360   :  { %v277_v9 = vmul.f32 %v276_v7, %v273_v6 }
 0x362   :  { %v282_v10 = vmul.f32 %v371_v8, %v277_v9 }
 0x364   :  { %283 = vxpose.xlu1.b32.start.end [1/1] (short) (narrow) %v282_v10, 64 }
 0x3e4   :  { %v299_v11 = vpop.trf.xlu1 }
 0x3e5   :  { %v316_v17 = vsel %vm315_vm3, %v299_v11, 0.0 }
 0x3e8   :  { %v300_v12 = vpop.trf.xlu1 }
 0x3e9   :  { %v317_v15 = vsel %vm315_vm3, %v300_v12, 0.0 }
 0x3ea   :  { %v318_v19 = vadd.f32 %v317_v15, %v316_v17 }
 0x3ec   :  { %v301_v13 = vpop.trf.xlu1 }
 0x3ed   :  { %v319_v18 = vsel %vm315_vm3, %v301_v13, 0.0 }
 0x3ee   :  { %v320_v21 = vadd.f32 %v319_v18, %v318_v19 }
 0x3f0   :  { %v302_v14 = vpop.trf.xlu1 }
 0x3f1   :  { %v321_v20 = vsel %vm315_vm3, %v302_v14, 0.0 }
 0x3f2   :  { %v322_v24 = vadd.f32 %v321_v20, %v320_v21 }
 0x3f4   :  { %v303_v16 = vpop.trf.xlu1 }
 0x3f5   :  { %v323_v23 = vsel %vm315_vm3, %v303_v16, 0.0 }
 0x3f6   :  { %v324_v26 = vadd.f32 %v323_v23, %v322_v24 }
 0x3f8   :  { %v304_v22 = vpop.trf.xlu1 }
 0x3f9   :  { %v325_v25 = vsel %vm315_vm3, %v304_v22, 0.0 }
 0x3fa   :  { %v326_v29 = vadd.f32 %v325_v25, %v324_v26 }
 0x3fc   :  { %v305_v27 = vpop.trf.xlu1 }
 0x3fd   :  { %v327_v28 = vsel %vm315_vm3, %v305_v27, 0.0 }
 0x3fe   :  { %v328_v30 = vadd.f32 %v327_v28, %v326_v29 }
 0x400   :  { %v306_v31 = vpop.trf.xlu1 }
 0x401   :  { %v329_v32 = vsel %vm315_vm3, %v306_v31, 0.0 }
 0x402   :  { %v330_v33 = vadd.f32 %v329_v32, %v328_v30 }
 0x404   :  { %v331_v34 = vrot.slane %v330_v33, 4 }
 0x406   :  { %v332_v35 = vadd.f32 %v331_v34, %v330_v33 }
 0x408   :  { %v333_v36 = vrot.slane %v332_v35, 2 }
 0x40a   :  { %v334_v37 = vadd.f32 %v333_v36, %v332_v35 }
 0x40c   :  { %v335_v38 = vrot.slane %v334_v37, 1 }
 0x40e   :  { %v336_v40 = vadd.f32 %v335_v38, %v334_v37 }
 0x410   :  { %v342_v41 = vadd.f32 %v340_v39, %v336_v40 }
 0x412   :  { %344 = vst.msk [vmem:[#allocation8] sm:$0x1] %vm343_vm4, %v342_v41 }
 0x413   :  { %523 = shalt.err (!%p520_p0)
}
 0x414   :  { %s524_s20 = scalar_lea.hbm %s666_s4, 16 }
 0x415   :  { %p525_p1 = scmp.ne.s32.totalorder %s666_s4, %s524_s20  ;;  %p528_p2 = scmp.lt.u32.totalorder %s524_s20, %s666_s4 }
 0x417   :  { %p530_p3 = pnand %p528_p2, %p525_p1 }
 0x419   :  { %533 = shalt.err (!%p530_p3)
}
 0x41a   :  { %354 = dma.vmem_to_hbm [thread:$0]  %s352_s15, 16, %s666_s4, [#allocation4]  }
 0x41b   :  { %538 = dma.done.wait [#allocation4], 16  }
 0x41c   :  { %539 = vsyncadd [#allocation4], 4294967280 }
 0x41d   :  { %358 = vsyncpa [#allocation3], 1 }
 0x41e   :  { %359 = vsyncpa [#allocation6], 1 }
 0x41f   :  { %360 = vsyncpa [#allocation4], 1 }

</bundles_post_ra>
